<compile_context>
chip_gen: v7x
topology: tpu7x:2x2x1
jax: 0.10.0
libtpu: 0.0.40
codegen_flags: <defaults>
</compile_context>

<pallas_src>
import functools

import jax
import jax.numpy as jnp
from jax.experimental import pallas as pl
from jax.experimental.pallas import tpu as pltpu


def _round_up(n, m):
    return ((n + m - 1) // m) * m


# --------------------------------------------------------------------------- #
# Kernel
# --------------------------------------------------------------------------- #
def _mlp_fused_kernel(*refs, n_layers: int, bf16_matmul: bool):
    """refs = (x_ref, w0_ref, b0_ref, w1_ref, b1_ref, ..., o_ref).

    Static Python loop over layers; the running activation `h` never leaves
    vregs/VMEM.  Matmuls accumulate in f32 on the MXU; tanh + bias stay in f32
    (v5e's VPU/EUP have no bf16).
    """
    x_ref = refs[0]
    o_ref = refs[-1]

    h = x_ref[...].astype(jnp.float32)  # (TB, in_dim)
    for i in range(n_layers):
        w_ref = refs[1 + 2 * i]
        b_ref = refs[2 + 2 * i]
        w = w_ref[...]
        lhs = h.astype(w.dtype) if bf16_matmul else h
        h = jnp.dot(lhs, w, preferred_element_type=jnp.float32) + b_ref[...]
        if i != n_layers - 1:
            h = jnp.tanh(h)  # EUP transcendental, f32
    o_ref[...] = h.astype(o_ref.dtype)


# --------------------------------------------------------------------------- #
# One-time parameter preparation (do NOT call per forward pass)
# --------------------------------------------------------------------------- #
def prepare_mlp_params(params, *, use_bf16_matmul: bool = False):
    """Pad internal hidden boundaries to 128 lanes and (optionally) cast weights to
    bf16, ONCE.  in_dim / out_dim are left unpadded so the forward pass needs no
    wrapper-side pad/slice of activations.

    Returns (flat_args, pdims) where flat_args = (w0, b0, w1, b1, ...) and pdims are
    the per-boundary feature widths the kernel sees.
    """
    n_layers = len(params)
    dims = [params[0][0].shape[0]] + [w.shape[1] for (w, _) in params]
    pdims = list(dims)
    for i in range(1, n_layers):  # only the hidden boundaries get lane-dense padding
        pdims[i] = _round_up(dims[i], 128)
    # TODO(synk): on v6e/v7x with real hidden dims >= 256, round hidden boundaries to
    # 256 instead to fully fill the 2x256x256 MXU tile.

    w_dtype = jnp.bfloat16 if use_bf16_matmul else jnp.float32
    flat = []
    for i, (w, b) in enumerate(params):
        fan_in, fan_out = w.shape
        w_p = jnp.pad(w, ((0, pdims[i] - fan_in), (0, pdims[i + 1] - fan_out)))
        b_p = jnp.pad(b, (0, pdims[i + 1] - fan_out)).reshape(1, pdims[i + 1])
        flat.append(w_p.astype(w_dtype))
        flat.append(b_p.astype(jnp.float32))  # bias add stays f32 (v5e-safe)
    return tuple(flat), tuple(pdims)


# --------------------------------------------------------------------------- #
# Forward pass
# --------------------------------------------------------------------------- #
def mlp_forward(x, flat_params, pdims, *, tb_max: int = 512):
    """Matches MLP.forward: (Linear -> Tanh) * n_hidden, then a final Linear.

    x: (batch, in_dim) f32 (unpadded).  flat_params/pdims from prepare_mlp_params.
    """
    batch, in_dim = x.shape
    n_layers = len(flat_params) // 2
    out_dim = pdims[-1]
    assert in_dim == pdims[0]
    bf16_matmul = flat_params[0].dtype == jnp.bfloat16

    # Batch tile: largest legal tile up to tb_max.  A tile equal to the full batch is
    # always legal; otherwise 512 (multiple of 8 sublanes) with Pallas masking the
    # final partial block.
    tb = batch if batch <= tb_max else tb_max
    grid = (pl.cdiv(batch, tb),)

    in_specs = [pl.BlockSpec((tb, in_dim), lambda i: (i, 0))]
    for j in range(n_layers):
        w = flat_params[2 * j]
        b = flat_params[2 * j + 1]
        # Constant index_map -> weights/biases stay resident in VMEM across batch tiles.
        in_specs.append(pl.BlockSpec(w.shape, lambda i: (0, 0)))
        in_specs.append(pl.BlockSpec(b.shape, lambda i: (0, 0)))
    out_specs = pl.BlockSpec((tb, out_dim), lambda i: (i, 0))

    # Cost estimate (advisory, helps XLA schedule neighbors around the custom call).
    flops = 0
    transcendentals = 0
    for j in range(n_layers):
        flops += 2 * batch * pdims[j] * pdims[j + 1]
        if j != n_layers - 1:
            transcendentals += batch * pdims[j + 1]
    param_bytes = sum(int(a.size) * a.dtype.itemsize for a in flat_params)
    bytes_accessed = (
        x.size * x.dtype.itemsize + param_bytes + batch * out_dim * 4
    )

    # VMEM budget: resident params + double-buffered activation/output tiles + the
    # widest working activation.  Re-derived against v7x's 64 MiB per-TC VMEM; raise
    # the scoped limit only as far as needed (v5e default is 16 MiB).
    max_feat = max(pdims)
    vmem_need = (
        param_bytes
        + 2 * tb * (in_dim + out_dim) * 4  # double-buffered in/out tiles
        + 2 * tb * max_feat * 4            # working activation headroom
    )
    vmem_limit = int(min(max(2 * vmem_need, 16 << 20), 48 << 20))

    out = pl.pallas_call(
        functools.partial(
            _mlp_fused_kernel, n_layers=n_layers, bf16_matmul=bf16_matmul
        ),
        out_shape=jax.ShapeDtypeStruct((batch, out_dim), jnp.float32),
        grid=grid,
        in_specs=in_specs,
        out_specs=out_specs,
        compiler_params=pltpu.CompilerParams(
            dimension_semantics=("parallel",),
            vmem_limit_bytes=vmem_limit,
        ),
        cost_estimate=pl.CostEstimate(
            flops=flops,
            transcendentals=transcendentals,
            bytes_accessed=bytes_accessed,
        ),
    )(x, *flat_params)
    return out


# --------------------------------------------------------------------------- #
# Init + pure-JAX reference
# --------------------------------------------------------------------------- #
def init_mlp_params(key, in_dim, out_dim, n_hidden, hidden_dim):
    """Deterministic init mimicking nn.Linear's U(-1/sqrt(fan_in), 1/sqrt(fan_in))."""
    dims = [in_dim] + [hidden_dim] * n_hidden + [out_dim]
    params = []
    for i in range(len(dims) - 1):
        fan_in, fan_out = dims[i], dims[i + 1]
        key, kw, kb = jax.random.split(key, 3)
        bound = 1.0 / jnp.sqrt(jnp.float32(fan_in))
        w = jax.random.uniform(kw, (fan_in, fan_out), jnp.float32, -bound, bound)
        b = jax.random.uniform(kb, (fan_out,), jnp.float32, -bound, bound)
        params.append((w, b))
    return params


def mlp_reference(x, params):
    h = x
    for i, (w, b) in enumerate(params):
        h = h @ w + b
        if i != len(params) - 1:
            h = jnp.tanh(h)
    return h


if __name__ == "__main__":
    # Small shapes consistent with the module's forward: x is (batch, in_dim).
    batch, in_dim, out_dim, n_hidden, hidden_dim = 8, 16, 4, 2, 32

    key = jax.random.PRNGKey(0)
    key, kx = jax.random.split(key)
    x = jax.random.normal(kx, (batch, in_dim), jnp.float32)

    params = init_mlp_params(key, in_dim, out_dim, n_hidden, hidden_dim)
    y_ref = mlp_reference(x, params)

    # f32 MXU operands (default, exact vs. f32 reference; safe on v5e/v6e/v7x).
    flat_f32, pdims = prepare_mlp_params(params, use_bf16_matmul=False)
    y = jax.block_until_ready(mlp_forward(x, flat_f32, pdims))
    assert y.shape == (batch, out_dim)
    assert jnp.allclose(y, y_ref, atol=1e-5, rtol=1e-5)

    # bf16 MXU operands (recommended on v6e/v7x): f32 accumulation, f32 tanh/bias.
    flat_bf16, pdims_bf16 = prepare_mlp_params(params, use_bf16_matmul=True)
    y_bf16 = jax.block_until_ready(mlp_forward(x, flat_bf16, pdims_bf16))
    assert y_bf16.shape == (batch, out_dim)
    assert jnp.allclose(y_bf16, y_ref, atol=5e-2, rtol=5e-2)

    print("KERNEL_OK")
</pallas_src>

<mosaic_0001>
module attributes {stable_mosaic.version = 11 : i64} {
  func.func @_mlp_fused_kernel(%arg0: i32, %arg1: memref<8x16xf32, #tpu.memory_space<vmem>>, %arg2: memref<16x128xf32, #tpu.memory_space<vmem>>, %arg3: memref<1x128xf32, #tpu.memory_space<vmem>>, %arg4: memref<128x128xf32, #tpu.memory_space<vmem>>, %arg5: memref<1x128xf32, #tpu.memory_space<vmem>>, %arg6: memref<128x4xf32, #tpu.memory_space<vmem>>, %arg7: memref<1x4xf32, #tpu.memory_space<vmem>>, %arg8: memref<8x4xf32, #tpu.memory_space<vmem>>) attributes {dimension_semantics = [#tpu.dimension_semantics<parallel>], iteration_bounds = array<i64: 1>, scalar_prefetch = 0 : i64, scratch_operands = 0 : i64, tpu.core_type = #tpu.core_type<tc>, window_params = [{transform_indices = @transform_0, window_bounds = array<i64: 8, 16>}, {pipeline_mode = #tpu.pipeline_mode<synchronous>, transform_indices = @transform_1, window_bounds = array<i64: 16, 128>}, {pipeline_mode = #tpu.pipeline_mode<synchronous>, transform_indices = @transform_2, window_bounds = array<i64: 1, 128>}, {pipeline_mode = #tpu.pipeline_mode<synchronous>, transform_indices = @transform_3, window_bounds = array<i64: 128, 128>}, {pipeline_mode = #tpu.pipeline_mode<synchronous>, transform_indices = @transform_4, window_bounds = array<i64: 1, 128>}, {pipeline_mode = #tpu.pipeline_mode<synchronous>, transform_indices = @transform_5, window_bounds = array<i64: 128, 4>}, {pipeline_mode = #tpu.pipeline_mode<synchronous>, transform_indices = @transform_6, window_bounds = array<i64: 1, 4>}, {transform_indices = @transform_7, window_bounds = array<i64: 8, 4>}]} {
    %c0 = arith.constant 0 : index
    %c0_0 = arith.constant 0 : index
    %0 = vector.load %arg1[%c0, %c0_0] : memref<8x16xf32, #tpu.memory_space<vmem>>, vector<8x16xf32>
    %c0_1 = arith.constant 0 : index
    %c0_2 = arith.constant 0 : index
    %1 = vector.load %arg2[%c0_1, %c0_2] : memref<16x128xf32, #tpu.memory_space<vmem>>, vector<16x128xf32>
    %cst = arith.constant dense<0.000000e+00> : vector<8x128xf32>
    %2 = tpu.matmul %0, %1, %cst {dimension_numbers = #tpu.dot_dimension_numbers<[1], [0], [0], [1], [0, 0, 1, 1], [], []>} : vector<8x16xf32>, vector<16x128xf32>, vector<8x128xf32> -> vector<8x128xf32>
    %c0_3 = arith.constant 0 : index
    %c0_4 = arith.constant 0 : index
    %3 = vector.load %arg3[%c0_3, %c0_4] : memref<1x128xf32, #tpu.memory_space<vmem>>, vector<1x128xf32>
    %4 = vector.broadcast %3 : vector<1x128xf32> to vector<8x128xf32>
    %5 = arith.addf %2, %4 : vector<8x128xf32>
    %6 = math.tanh %5 : vector<8x128xf32>
    %c0_5 = arith.constant 0 : index
    %c0_6 = arith.constant 0 : index
    %7 = vector.load %arg4[%c0_5, %c0_6] : memref<128x128xf32, #tpu.memory_space<vmem>>, vector<128x128xf32>
    %cst_7 = arith.constant dense<0.000000e+00> : vector<8x128xf32>
    %8 = tpu.matmul %6, %7, %cst_7 {dimension_numbers = #tpu.dot_dimension_numbers<[1], [0], [0], [1], [0, 0, 1, 1], [], []>} : vector<8x128xf32>, vector<128x128xf32>, vector<8x128xf32> -> vector<8x128xf32>
    %c0_8 = arith.constant 0 : index
    %c0_9 = arith.constant 0 : index
    %9 = vector.load %arg5[%c0_8, %c0_9] : memref<1x128xf32, #tpu.memory_space<vmem>>, vector<1x128xf32>
    %10 = vector.broadcast %9 : vector<1x128xf32> to vector<8x128xf32>
    %11 = arith.addf %8, %10 : vector<8x128xf32>
    %12 = math.tanh %11 : vector<8x128xf32>
    %c0_10 = arith.constant 0 : index
    %c0_11 = arith.constant 0 : index
    %13 = vector.load %arg6[%c0_10, %c0_11] : memref<128x4xf32, #tpu.memory_space<vmem>>, vector<128x4xf32>
    %cst_12 = arith.constant dense<0.000000e+00> : vector<8x4xf32>
    %14 = tpu.matmul %12, %13, %cst_12 {dimension_numbers = #tpu.dot_dimension_numbers<[1], [0], [0], [1], [0, 0, 1, 1], [], []>} : vector<8x128xf32>, vector<128x4xf32>, vector<8x4xf32> -> vector<8x4xf32>
    %c0_13 = arith.constant 0 : index
    %c0_14 = arith.constant 0 : index
    %15 = vector.load %arg7[%c0_13, %c0_14] : memref<1x4xf32, #tpu.memory_space<vmem>>, vector<1x4xf32>
    %16 = vector.broadcast %15 : vector<1x4xf32> to vector<8x4xf32>
    %17 = arith.addf %14, %16 : vector<8x4xf32>
    %c0_15 = arith.constant 0 : index
    %c0_16 = arith.constant 0 : index
    %18 = vector.load %arg8[%c0_15, %c0_16] : memref<8x4xf32, #tpu.memory_space<vmem>>, vector<8x4xf32>
    tpu.vector_store %arg8[%c0_15, %c0_16], %17 {strides = array<i32>} : memref<8x4xf32, #tpu.memory_space<vmem>>, vector<8x4xf32>,
    return
  }
  func.func @transform_0(%arg0: i32) -> (i32, i32) {
    %c0_i32 = arith.constant 0 : i32
    %c0_i32_0 = arith.constant 0 : i32
    return %arg0, %c0_i32 : i32, i32
  }
  func.func @transform_1(%arg0: i32) -> (i32, i32) {
    %c0_i32 = arith.constant 0 : i32
    %c0_i32_0 = arith.constant 0 : i32
    %c0_i32_1 = arith.constant 0 : i32
    return %c0_i32, %c0_i32_0 : i32, i32
  }
  func.func @transform_2(%arg0: i32) -> (i32, i32) {
    %c0_i32 = arith.constant 0 : i32
    %c0_i32_0 = arith.constant 0 : i32
    %c0_i32_1 = arith.constant 0 : i32
    return %c0_i32, %c0_i32_0 : i32, i32
  }
  func.func @transform_3(%arg0: i32) -> (i32, i32) {
    %c0_i32 = arith.constant 0 : i32
    %c0_i32_0 = arith.constant 0 : i32
    %c0_i32_1 = arith.constant 0 : i32
    return %c0_i32, %c0_i32_0 : i32, i32
  }
  func.func @transform_4(%arg0: i32) -> (i32, i32) {
    %c0_i32 = arith.constant 0 : i32
    %c0_i32_0 = arith.constant 0 : i32
    %c0_i32_1 = arith.constant 0 : i32
    return %c0_i32, %c0_i32_0 : i32, i32
  }
  func.func @transform_5(%arg0: i32) -> (i32, i32) {
    %c0_i32 = arith.constant 0 : i32
    %c0_i32_0 = arith.constant 0 : i32
    %c0_i32_1 = arith.constant 0 : i32
    return %c0_i32, %c0_i32_0 : i32, i32
  }
  func.func @transform_6(%arg0: i32) -> (i32, i32) {
    %c0_i32 = arith.constant 0 : i32
    %c0_i32_0 = arith.constant 0 : i32
    %c0_i32_1 = arith.constant 0 : i32
    return %c0_i32, %c0_i32_0 : i32, i32
  }
  func.func @transform_7(%arg0: i32) -> (i32, i32) {
    %c0_i32 = arith.constant 0 : i32
    %c0_i32_0 = arith.constant 0 : i32
    return %arg0, %c0_i32 : i32, i32
  }
}

</mosaic_0001>

<bundles_post_ra>
// kernel: tpu_custom_call.1
= control target key start
LH: loop header
LB: loop body
LE: loop exit
PB: predicated region body
PF: predicated region fallthrough
CT: control target
= control target key end

     0   :  { %12 = vsyncpa [#allocation3], 0  ;;  %s522_s24 = smov [#allocation2]   ;;  %s711_s0 = inlined_call_operand.vmem [shape: f32[8,16], index: 0, kind: input, shape index: {}]   ;;  %s712_s1 = inlined_call_operand.hbm [shape: f32[16,128], index: 1, kind: input, shape index: {}]   ;;  %s713_s2 = inlined_call_operand.vmem [shape: f32[1,128], index: 2, kind: input, shape index: {}]   ;;  %s714_s3 = inlined_call_operand.vmem [shape: f32[128,128], index: 3, kind: input, shape index: {}]   ;;  %s715_s4 = inlined_call_operand.vmem [shape: f32[1,128], index: 4, kind: input, shape index: {}]   ;;  %s716_s5 = inlined_call_operand.vmem [shape: f32[128,4], index: 5, kind: input, shape index: {}]   ;;  %s717_s6 = inlined_call_operand.vmem [shape: f32[1,4], index: 6, kind: input, shape index: {}]   ;;  %s718_s7 = inlined_call_operand.vmem [shape: f32[8,4], index: 7, kind: output, shape index: {}]  }
   0x1   :  { %s20_s25 = sshll.u32 %s522_s24, 4  ;;  %s498_s28 = scalar_lea.hbm %s712_s1, 256  ;;  %s21_s25 = int_to_ptr.vmem [resolvable:$true] %s20_s25 }
   0x2   :  { %p499_p0 = scmp.ne.s32.totalorder %s712_s1, %s498_s28  ;;  %p502_p1 = scmp.lt.u32.totalorder %s498_s28, %s712_s1 }
   0x4   :  { %p504_p2 = pnand %p502_p1, %p499_p0 }
   0x6   :  { %507 = shalt.err (!%p504_p2)
}
   0x7   :  { %s508_s10 = scalar_lea.vmem %s21_s25, 256  ;;  %p513_p4 = scmp.lt.s32.totalorder %s21_s25, %s21_s25 }
   0x8   :  { %p509_p3 = scmp.ne.s32.totalorder %s21_s25, %s508_s10  ;;  %p514_p5 = scmp.lt.s32.totalorder %s508_s10, %s508_s10 }
   0xa   :  { %p515_p6 = por %p514_p5, %p513_p4 }
   0xc   :  { %p516_p7 = pnand %p515_p6, %p509_p3 }
   0xe   :  { %519 = shalt.err (!%p516_p7)
}
   0xf   :  { %s523_s11 = smov 128   ;;  %s524_s12 = smov 8  }
  0x10   :  { %26 = dma.hbm_to_vmem [thread:$0]  %s712_s1, 256, %s21_s25, [#allocation3], %s523_s11, %s523_s11, %s524_s12  }
  0x11   :  { %520 = dma.done.wait [#allocation3], 256  }
  0x12   :  { %521 = vsyncadd [#allocation3], 4294967040  ;;  %v525_v0 = vmov 0.0|0.0   ;;  %vm526_vm0 = vmmov 0   ;;  %v527_v1 = vmov 0.0   ;;  %v41_v2 = vld [vmem:[#allocation2] sm:$0xff] }
  0x13   :  { %437 = vmatprep.subr.bf16.mxu0 %v525_v0  ;;  %364 = vmatprep.mubr.msk.f32.mxu0 %vm526_vm0, %v527_v1  ;;  %v42_v3 = vld [vmem:[#allocation2 + $0x8] sm:$0xff]  ;;  %v125_v5 = vld [vmem:[%s714_s3] sm:$0xff]  ;;  %v127_v7 = vld [vmem:[%s714_s3 + $0x10] sm:$0xff]  ;;  %vm50_vm1 = vcmask 130048   ;;  %vm312_vm2 = vcmask 31744  }
  0x14   :  { %440 = vmatprep.subr.bf16.mxu1 %v525_v0  ;;  %399 = vmatprep.mubr.msk.f32.mxu1 %vm526_vm0, %v527_v1  ;;  %v438_v4 = vpack.c.bf16 %v42_v3, %v41_v2  ;;  %v126_v6 = vld [vmem:[%s714_s3 + $0x8] sm:$0xff]  ;;  %v128_v9 = vld [vmem:[%s714_s3 + $0x18] sm:$0xff]  ;;  %v40_v10 = vld [vmem:[%s711_s0] sm:$0xff] }
  0x15   :  { %v441_v8 = vpack.c.bf16 %v126_v6, %v125_v5  ;;  %v444_v11 = vpack.c.bf16 %v128_v9, %v127_v7  ;;  %v129_v12 = vld [vmem:[%s714_s3 + $0x20] sm:$0xff]  ;;  %v130_v13 = vld [vmem:[%s714_s3 + $0x28] sm:$0xff]  ;;  %v131_v15 = vld [vmem:[%s714_s3 + $0x30] sm:$0xff] }
  0x16   :  { %439 = vmatpush3.bf16.msra.mxu0 %v438_v4  ;;  %v447_v14 = vpack.c.bf16 %v130_v13, %v129_v12  ;;  %v132_v16 = vld [vmem:[%s714_s3 + $0x38] sm:$0xff]  ;;  %v133_v18 = vld [vmem:[%s714_s3 + $0x40] sm:$0xff]  ;;  %v134_v19 = vld [vmem:[%s714_s3 + $0x48] sm:$0xff] }
  0x17   :  { %442 = vmatpush3.bf16.msra.mxu1 %v441_v8  ;;  %464 = vmatprep.subr.bf16.mxu0 %v525_v0  ;;  %v450_v17 = vpack.c.bf16 %v132_v16, %v131_v15  ;;  %v453_v20 = vpack.c.bf16 %v134_v19, %v133_v18  ;;  %v135_v21 = vld [vmem:[%s714_s3 + $0x50] sm:$0xff]  ;;  %v136_v22 = vld [vmem:[%s714_s3 + $0x58] sm:$0xff]  ;;  %v137_v24 = vld [vmem:[%s714_s3 + $0x60] sm:$0xff] }
  0x18   :  { %443 = vmatprep.subr.bf16.mxu1 %v525_v0  ;;  %v456_v23 = vpack.c.bf16 %v136_v22, %v135_v21  ;;  %v138_v25 = vld [vmem:[%s714_s3 + $0x68] sm:$0xff]  ;;  %v139_v27 = vld [vmem:[%s714_s3 + $0x70] sm:$0xff]  ;;  %v140_v28 = vld [vmem:[%s714_s3 + $0x78] sm:$0xff] }
  0x19   :  { %365 = vmatmul.mubr.msk.f32.vlgmr.msra.gmra.mrb[0].mxu0 %vm50_vm1, %v40_v10  ;;  %v459_v26 = vpack.c.bf16 %v138_v25, %v137_v24  ;;  %v462_v29 = vpack.c.bf16 %v140_v28, %v139_v27  ;;  %v219_v30 = vld [vmem:[%s716_s5] sm:$0xff]  ;;  %v220_v31 = vld [vmem:[%s716_s5 + $0x8] sm:$0xff]  ;;  %v221_v32 = vld [vmem:[%s716_s5 + $0x10] sm:$0xff] }
  0x1a   :  { %434 = vmatprep.mubr.msk.f32.mxu0 %vm526_vm0, %v527_v1  ;;  %v465_v33 = vpack.c.bf16 %v220_v31, %v219_v30  ;;  %v222_v34 = vld [vmem:[%s716_s5 + $0x18] sm:$0xff]  ;;  %v223_v36 = vld [vmem:[%s716_s5 + $0x20] sm:$0xff]  ;;  %v224_v37 = vld [vmem:[%s716_s5 + $0x28] sm:$0xff] }
  0x1b   :  { %445 = vmatpush3.bf16.msra.mxu1 %v444_v11  ;;  %v468_v35 = vpack.c.bf16 %v222_v34, %v221_v32  ;;  %v471_v38 = vpack.c.bf16 %v224_v37, %v223_v36  ;;  %v225_v39 = vld [vmem:[%s716_s5 + $0x30] sm:$0xff]  ;;  %v226_v40 = vld [vmem:[%s716_s5 + $0x38] sm:$0xff]  ;;  %v227_v42 = vld [vmem:[%s716_s5 + $0x40] sm:$0xff] }
  0x1c   :  { %446 = vmatprep.subr.bf16.mxu1 %v525_v0  ;;  %466 = vmatpush3.bf16.msra.mxu0 %v465_v33  ;;  %v474_v41 = vpack.c.bf16 %v226_v40, %v225_v39  ;;  %v228_v43 = vld [vmem:[%s716_s5 + $0x48] sm:$0xff]  ;;  %v319_v45 = vld [vmem:[%s713_s2] ss:$0 sm:$0xff]  ;;  %v229_v50 = vld [vmem:[%s716_s5 + $0x50] sm:$0xff] }
  0x1d   :  { %467 = vmatprep.subr.bf16.mxu0 %v525_v0  ;;  %v477_v44 = vpack.c.bf16 %v228_v43, %v227_v42  ;;  %v230_v51 = vld [vmem:[%s716_s5 + $0x58] sm:$0xff]  ;;  %v231_v53 = vld [vmem:[%s716_s5 + $0x60] sm:$0xff]  ;;  %v232_v54 = vld [vmem:[%s716_s5 + $0x68] sm:$0xff] }
  0x1e   :  { %v480_v52 = vpack.c.bf16 %v230_v51, %v229_v50  ;;  %v483_v55 = vpack.c.bf16 %v232_v54, %v231_v53  ;;  %v233_v56 = vld [vmem:[%s716_s5 + $0x70] sm:$0xff]  ;;  %v234_v57 = vld [vmem:[%s716_s5 + $0x78] sm:$0xff]  ;;  %v321_v59 = vld [vmem:[%s715_s4] ss:$0 sm:$0xff] }
  0x1f   :  { %448 = vmatpush3.bf16.msra.mxu1 %v447_v14  ;;  %v486_v58 = vpack.c.bf16 %v234_v57, %v233_v56  ;;  %v322_v1 = vld [vmem:[%s717_s6] ss:$0 sm:$0xff] }
  0x20   :  { %449 = vmatprep.subr.bf16.mxu1 %v525_v0  ;;  %469 = vmatpush3.bf16.msra.mxu0 %v468_v35 }
  0x21   :  { %470 = vmatprep.subr.bf16.mxu0 %v525_v0 }
  0x23   :  { %451 = vmatpush3.bf16.msra.mxu1 %v450_v17 }
  0x24   :  { %452 = vmatprep.subr.bf16.mxu1 %v525_v0  ;;  %472 = vmatpush3.bf16.msra.mxu0 %v471_v38 }
  0x25   :  { %473 = vmatprep.subr.bf16.mxu0 %v525_v0 }
  0x27   :  { %454 = vmatpush3.bf16.msra.mxu1 %v453_v20 }
  0x28   :  { %455 = vmatprep.subr.bf16.mxu1 %v525_v0  ;;  %475 = vmatpush3.bf16.msra.mxu0 %v474_v41 }
  0x29   :  { %476 = vmatprep.subr.bf16.mxu0 %v525_v0 }
  0x2b   :  { %457 = vmatpush3.bf16.msra.mxu1 %v456_v23 }
  0x2c   :  { %458 = vmatprep.subr.bf16.mxu1 %v525_v0  ;;  %478 = vmatpush3.bf16.msra.mxu0 %v477_v44 }
  0x2d   :  { %479 = vmatprep.subr.bf16.mxu0 %v525_v0 }
  0x2f   :  { %460 = vmatpush3.bf16.msra.mxu1 %v459_v26 }
  0x30   :  { %461 = vmatprep.subr.bf16.mxu1 %v525_v0  ;;  %481 = vmatpush3.bf16.msra.mxu0 %v480_v52 }
  0x31   :  { %482 = vmatprep.subr.bf16.mxu0 %v525_v0 }
  0x33   :  { %463 = vmatpush3.bf16.msra.mxu1 %v462_v29 }
  0x34   :  { %484 = vmatpush3.bf16.msra.mxu0 %v483_v55 }
  0x35   :  { %485 = vmatprep.subr.bf16.mxu0 %v525_v0 }
  0x38   :  { %487 = vmatpush3.bf16.msra.mxu0 %v486_v58 }
  0xec   :  { %v120_v46 = vpop.f32.mrb[0].mxu0 }
  0xed   :  { %v121_v47 = vadd.f32 %v319_v45, %v120_v46  ;;  %v366_v48 = vpop.f32.mrb[1].mxu0 }
  0xef   :  { %494 = vtanh.f32 %v121_v47 }
  0xf9   :  { %v495_v49 = vpop.eup %494 }
  0xfa   :  { %400 = vmatmul.mubr.f32.vlgmr.msra.gmra.mrb[0].mxu1 %v495_v49 }
 0x1cd   :  { %v214_v60 = vpop.f32.mrb[0].mxu1 }
 0x1ce   :  { %v215_v61 = vadd.f32 %v321_v59, %v214_v60  ;;  %v401_v62 = vpop.f32.mrb[1].mxu1 }
 0x1d0   :  { %496 = vtanh.f32 %v215_v61 }
 0x1da   :  { %v497_v63 = vpop.eup %496 }
 0x1db   :  { %435 = vmatmul.mubr.f32.vlgmr.msra.gmra.mrb[2].mxu0 %v497_v63 }
 0x2ae   :  { %v308_v2 = vpop.f32.mrb[2].mxu0 }
 0x2af   :  { %v309_v3 = vadd.f32 %v322_v1, %v308_v2  ;;  %v436_v4 = vpop.f32.mrb[3].mxu0 }
 0x2b1   :  { %313 = vst.msk [vmem:[%s718_s7] sm:$0xff] %vm312_vm2, %v309_v3 }
 0x2b2   :  { %318 = vsyncpa [#allocation3], 1 }

</bundles_post_ra>
